<compile_context>
chip_gen: v7x
topology: tpu7x:2x2x1
jax: 0.10.0
libtpu: 0.0.40
codegen_flags: <defaults>
</compile_context>

<pallas_src>
import functools

import jax
import jax.numpy as jnp
from jax import lax
from jax.experimental import pallas as pl
from jax.experimental.pallas import tpu as pltpu


# ---------------------------------------------------------------------------
# Tiled linear:  y = x @ W + b   (bf16 MXU inputs, f32 accumulation)
# ---------------------------------------------------------------------------
def _linear_kernel(x_ref, w_ref, b_ref, o_ref, acc_ref):
    k = pl.program_id(2)

    @pl.when(k == 0)
    def _():
        acc_ref[...] = jnp.zeros_like(acc_ref)

    x = x_ref[...]
    w = w_ref[...]
    # Inputs are expected to already be bf16 in HBM; these are trace-time no-ops
    # in that case (safety net only).
    if x.dtype != jnp.bfloat16:
        x = x.astype(jnp.bfloat16)
    if w.dtype != jnp.bfloat16:
        w = w.astype(jnp.bfloat16)

    acc_ref[...] += jnp.dot(x, w, preferred_element_type=jnp.float32)

    @pl.when(k == pl.num_programs(2) - 1)
    def _():
        o_ref[...] = (acc_ref[...] + b_ref[...]).astype(o_ref.dtype)


def _pick_tile(dim, preferred, quantum):
    """Largest multiple of `quantum` <= preferred that divides `dim`; falls
    back to the full (always legal) extent."""
    if dim <= preferred:
        return dim
    t = (preferred // quantum) * quantum
    while t >= quantum:
        if dim % t == 0:
            return t
        t -= quantum
    return dim


def linear(x2d, w, b, *, out_dtype=jnp.bfloat16, tm=256, tn=512, tk=1024):
    """x2d: (M, Din) bf16; w: (Din, Dout) bf16; b: (Dout,) f32 -> (M, Dout)."""
    M, Din = x2d.shape
    Dout = w.shape[1]
    tm = _pick_tile(M, tm, 8)
    tn = _pick_tile(Dout, tn, 128)
    tk = _pick_tile(Din, tk, 128)
    grid = (M // tm, Dout // tn, Din // tk)
    return pl.pallas_call(
        _linear_kernel,
        out_shape=jax.ShapeDtypeStruct((M, Dout), out_dtype),
        grid_spec=pltpu.PrefetchScalarGridSpec(
            num_scalar_prefetch=0,
            grid=grid,
            in_specs=[
                pl.BlockSpec((tm, tk), lambda i, j, k: (i, k)),
                pl.BlockSpec((tk, tn), lambda i, j, k: (k, j)),
                pl.BlockSpec((1, tn), lambda i, j, k: (0, j)),
            ],
            out_specs=pl.BlockSpec((tm, tn), lambda i, j, k: (i, j)),
            scratch_shapes=[pltpu.VMEM((tm, tn), jnp.float32)],
        ),
        compiler_params=pltpu.CompilerParams(
            dimension_semantics=("parallel", "parallel", "arbitrary")
        ),
    )(x2d, w, b.reshape(1, Dout))


# ---------------------------------------------------------------------------
# Scaled dot-product attention + in-kernel head mean of the weights
# grid = (batch, Sq tiles, heads); head is the (innermost) reduction axis for
# the mean-attention-weights accumulator.
# ---------------------------------------------------------------------------
def _attn_compute(q, k, v, add_mask, o_ref, wmean_ref, *, scale, inv_heads):
    h = pl.program_id(2)

    # Fold 1/sqrt(dk) into the (tq, depth) q tile: Sq*depth muls instead of
    # an Sq*Sk mul on the logits (VALU is the binding slot at depth=128).
    qs = q * jnp.asarray(scale, dtype=q.dtype)

    # Q @ K^T contracting the last (depth) axis of both -> no explicit k.T.
    logits = lax.dot_general(
        qs, k, dimension_numbers=(((1,), (1,)), ((), ())),
        preferred_element_type=jnp.float32,
    )
    if add_mask is not None:
        logits = logits + add_mask

    # Numerically-stable softmax. Exact f32 reciprocal: the attention weights
    # are returned to the caller, so rows must sum to 1 to f32 precision.
    m = jnp.max(logits, axis=-1, keepdims=True)
    e = jnp.exp(logits - m)
    denom = jnp.sum(e, axis=-1, keepdims=True)
    attn = e * (1.0 / denom)

    o_ref[...] = jnp.dot(
        attn.astype(jnp.bfloat16), v, preferred_element_type=jnp.float32
    ).astype(o_ref.dtype)

    # Head-mean accumulation: unscaled adds, single 1/H multiply on last head.
    @pl.when(h == 0)
    def _():
        wmean_ref[...] = attn

    @pl.when(h != 0)
    def _():
        wmean_ref[...] += attn

    @pl.when(h == pl.num_programs(2) - 1)
    def _():
        wmean_ref[...] = wmean_ref[...] * inv_heads


def _attn_body_masked(q_ref, k_ref, v_ref, mask_ref, o_ref, wmean_ref, *,
                      scale, inv_heads):
    _attn_compute(q_ref[...], k_ref[...], v_ref[...], mask_ref[...],
                  o_ref, wmean_ref, scale=scale, inv_heads=inv_heads)


def _attn_body_nomask(q_ref, k_ref, v_ref, o_ref, wmean_ref, *,
                      scale, inv_heads):
    _attn_compute(q_ref[...], k_ref[...], v_ref[...], None,
                  o_ref, wmean_ref, scale=scale, inv_heads=inv_heads)


def _mask_spec(add_mask, B, H, tq, Sk):
    """BlockSpec for an additive mask of shape (Bm, Hm, Sq, Sk) where Bm in
    {1, B} and Hm in {1, H}; no dense broadcast over batch/head is needed."""
    Bm, Hm = add_mask.shape[0], add_mask.shape[1]
    bi = (lambda b: b) if Bm == B else (lambda b: 0)
    hi = (lambda h: h) if (Hm == H and H > 1) else (lambda h: 0)
    return pl.BlockSpec((None, None, tq, Sk),
                        lambda b, s, h: (bi(b), hi(h), s, 0))


def _attention_headcols(q_src, k_src, v_src, add_mask, *, num_heads, depth,
                        d_model, q_off, k_off, v_off, tq_pref=256):
    """Heads indexed via BlockSpec column blocks of (B, S, D)-layout arrays.
    Requires depth % 128 == 0. Output is written directly in concat layout."""
    B, Sq, _ = q_src.shape
    Sk = k_src.shape[1]
    tq = _pick_tile(Sq, tq_pref, 8)
    nq = Sq // tq
    scale = 1.0 / float(depth) ** 0.5
    inv_heads = 1.0 / num_heads

    in_specs = [
        pl.BlockSpec((None, tq, depth), lambda b, s, h: (b, s, q_off + h)),
        pl.BlockSpec((None, Sk, depth), lambda b, s, h: (b, 0, k_off + h)),
        pl.BlockSpec((None, Sk, depth), lambda b, s, h: (b, 0, v_off + h)),
    ]
    args = [q_src, k_src, v_src]
    if add_mask is not None:
        in_specs.append(_mask_spec(add_mask, B, num_heads, tq, Sk))
        args.append(add_mask)
        body = functools.partial(_attn_body_masked, scale=scale,
                                 inv_heads=inv_heads)
    else:
        body = functools.partial(_attn_body_nomask, scale=scale,
                                 inv_heads=inv_heads)

    out, wmean = pl.pallas_call(
        body,
        out_shape=(
            jax.ShapeDtypeStruct((B, Sq, d_model), jnp.bfloat16),
            jax.ShapeDtypeStruct((B, Sq, Sk), jnp.float32),
        ),
        grid_spec=pltpu.PrefetchScalarGridSpec(
            num_scalar_prefetch=0,
            grid=(B, nq, num_heads),
            in_specs=in_specs,
            out_specs=[
                pl.BlockSpec((None, tq, depth), lambda b, s, h: (b, s, h)),
                pl.BlockSpec((None, tq, Sk), lambda b, s, h: (b, s, 0)),
            ],
        ),
        compiler_params=pltpu.CompilerParams(
            dimension_semantics=("parallel", "parallel", "arbitrary")
        ),
    )(*args)
    return out, wmean


def _attention_split(qh, kh, vh, add_mask, *, num_heads, tq_pref=256):
    """Fallback for depth % 128 != 0: explicit (B, H, S, depth) head layout."""
    B, H, Sq, depth = qh.shape
    Sk = kh.shape[2]
    tq = _pick_tile(Sq, tq_pref, 8)
    nq = Sq // tq
    scale = 1.0 / float(depth) ** 0.5
    inv_heads = 1.0 / num_heads

    in_specs = [
        pl.BlockSpec((None, None, tq, depth), lambda b, s, h: (b, h, s, 0)),
        pl.BlockSpec((None, None, Sk, depth), lambda b, s, h: (b, h, 0, 0)),
        pl.BlockSpec((None, None, Sk, depth), lambda b, s, h: (b, h, 0, 0)),
    ]
    args = [qh, kh, vh]
    if add_mask is not None:
        in_specs.append(_mask_spec(add_mask, B, H, tq, Sk))
        args.append(add_mask)
        body = functools.partial(_attn_body_masked, scale=scale,
                                 inv_heads=inv_heads)
    else:
        body = functools.partial(_attn_body_nomask, scale=scale,
                                 inv_heads=inv_heads)

    out_h, wmean = pl.pallas_call(
        body,
        out_shape=(
            jax.ShapeDtypeStruct((B, H, Sq, depth), jnp.bfloat16),
            jax.ShapeDtypeStruct((B, Sq, Sk), jnp.float32),
        ),
        grid_spec=pltpu.PrefetchScalarGridSpec(
            num_scalar_prefetch=0,
            grid=(B, nq, H),
            in_specs=in_specs,
            out_specs=[
                pl.BlockSpec((None, None, tq, depth), lambda b, s, h: (b, h, s, 0)),
                pl.BlockSpec((None, tq, Sk), lambda b, s, h: (b, s, 0)),
            ],
        ),
        compiler_params=pltpu.CompilerParams(
            dimension_semantics=("parallel", "parallel", "arbitrary")
        ),
    )(*args)
    return out_h, wmean


# ---------------------------------------------------------------------------
# MultiHeadAttention forward (kernel-side parameters passed explicitly)
# ---------------------------------------------------------------------------
def multi_head_attention(kparams, v, k, q, mask, *, num_heads):
    """v, k, q: (B, S, d_model); mask broadcastable to (B, 1, Sq, Sk) or None.

    `kparams` must come from prepare_params() (bf16 weights, fused QKV)."""
    B, Sq, d_model = q.shape
    Sk = k.shape[1]
    depth = d_model // num_heads
    assert depth * num_heads == d_model

    aligned = (depth % 128 == 0)
    fuse_qkv = aligned and (q is k) and (k is v)

    # bf16 at the HBM boundary; f32 accumulation stays in-kernel.
    q_b = q.astype(jnp.bfloat16)
    if fuse_qkv:
        k_b = v_b = q_b
    else:
        k_b = k.astype(jnp.bfloat16)
        v_b = v.astype(jnp.bfloat16)

    # Pre-scaled additive mask (torch's `logits += mask * -1e19`). Kept at the
    # caller's batch/head extent — NOT densely broadcast over batch/head.
    if mask is None:
        add_mask = None
    else:
        add_mask = jnp.asarray(mask, jnp.float32) * jnp.float32(-1e19)
        while add_mask.ndim < 4:
            add_mask = add_mask[None]
        add_mask = jnp.broadcast_to(
            add_mask, (add_mask.shape[0], add_mask.shape[1], Sq, Sk)
        )

    if fuse_qkv:
        # Self-attention fast path: one projection, x read from HBM once;
        # fused weights were concatenated once in prepare_params.
        qkv = linear(q_b.reshape(B * Sq, d_model),
                     kparams["qkv_w"], kparams["qkv_b"])
        qkv = qkv.reshape(B, Sq, 3 * d_model)
        concat, attn_mean = _attention_headcols(
            qkv, qkv, qkv, add_mask,
            num_heads=num_heads, depth=depth, d_model=d_model,
            q_off=0, k_off=num_heads, v_off=2 * num_heads,
        )
    else:
        qp = linear(q_b.reshape(B * Sq, d_model), kparams["wq_w"], kparams["wq_b"])
        kp = linear(k_b.reshape(B * Sk, d_model), kparams["wk_w"], kparams["wk_b"])
        vp = linear(v_b.reshape(B * Sk, d_model), kparams["wv_w"], kparams["wv_b"])
        qp = qp.reshape(B, Sq, d_model)
        kp = kp.reshape(B, Sk, d_model)
        vp = vp.reshape(B, Sk, d_model)
        if aligned:
            concat, attn_mean = _attention_headcols(
                qp, kp, vp, add_mask,
                num_heads=num_heads, depth=depth, d_model=d_model,
                q_off=0, k_off=0, v_off=0,
            )
        else:
            # General-depth fallback: explicit head split (extra transposes).
            def split(x):
                B_, S_, _ = x.shape
                return x.reshape(B_, S_, num_heads, depth).transpose(0, 2, 1, 3)

            out_h, attn_mean = _attention_split(
                split(qp), split(kp), split(vp), add_mask, num_heads=num_heads
            )
            concat = out_h.transpose(0, 2, 1, 3).reshape(B, Sq, d_model)

    out = linear(
        concat.reshape(B * Sq, d_model),
        kparams["dense_w"], kparams["dense_b"], out_dtype=jnp.float32,
    ).reshape(B, Sq, d_model)

    return out, attn_mean


# ---------------------------------------------------------------------------
# Parameters: f32 master params + one-time kernel-side (bf16, fused) params
# ---------------------------------------------------------------------------
def init_params(key, d_model):
    names = ["wq", "wk", "wv", "dense"]
    keys = jax.random.split(key, 2 * len(names))
    params = {}
    bound = 1.0 / float(d_model) ** 0.5
    for i, n in enumerate(names):
        # stored as (d_in, d_out) so kernels do x @ W directly
        params[n + "_w"] = jax.random.uniform(
            keys[2 * i], (d_model, d_model), jnp.float32, -bound, bound
        )
        params[n + "_b"] = jax.random.uniform(
            keys[2 * i + 1], (d_model,), jnp.float32, -bound, bound
        )
    return params


def prepare_params(params):
    """One-time conversion: bf16 weights in HBM + pre-fused QKV weight/bias
    (hoisted out of the forward pass)."""
    kp = {}
    for n in ["wq", "wk", "wv", "dense"]:
        kp[n + "_w"] = params[n + "_w"].astype(jnp.bfloat16)
        kp[n + "_b"] = params[n + "_b"].astype(jnp.float32)
    kp["qkv_w"] = jnp.concatenate(
        [kp["wq_w"], kp["wk_w"], kp["wv_w"]], axis=1
    )
    kp["qkv_b"] = jnp.concatenate(
        [kp["wq_b"], kp["wk_b"], kp["wv_b"]], axis=0
    )
    return jax.tree_util.tree_map(jax.block_until_ready, kp)


# ---------------------------------------------------------------------------
# Pure-JAX reference (f32) for correctness checking
# ---------------------------------------------------------------------------
def reference_mha(params, v, k, q, mask, *, num_heads):
    B, Sq, d_model = q.shape
    depth = d_model // num_heads

    def lin(x, n):
        return x @ params[n + "_w"] + params[n + "_b"]

    def split(x):
        B_, S_, _ = x.shape
        return x.reshape(B_, S_, num_heads, depth).transpose(0, 2, 1, 3)

    qh, kh, vh = split(lin(q, "wq")), split(lin(k, "wk")), split(lin(v, "wv"))
    logits = jnp.einsum("bhqd,bhkd->bhqk", qh, kh) / jnp.sqrt(jnp.float32(depth))
    if mask is not None:
        logits = logits + mask * jnp.float32(-1e19)
    w = jax.nn.softmax(logits, axis=-1)
    o = jnp.einsum("bhqk,bhkd->bhqd", w, vh)
    concat = o.transpose(0, 2, 1, 3).reshape(B, Sq, d_model)
    out = concat @ params["dense_w"] + params["dense_b"]
    return out, jnp.mean(w, axis=1)


if __name__ == "__main__":
    # depth = d_model / num_heads = 128 -> lane-aligned per-head column blocks.
    d_model = 256
    num_heads = 2
    B, S = 2, 8

    root = jax.random.PRNGKey(0)
    kp_key, kx_key, ky_key = jax.random.split(root, 3)
    params = init_params(kp_key, d_model)
    kparams = prepare_params(params)   # one-time bf16 cast + QKV fusion

    x = jax.random.normal(kx_key, (B, S, d_model), jnp.float32)

    # look-ahead (causal) mask: 1.0 where attention is NOT allowed
    causal = 1.0 - jnp.tril(jnp.ones((S, S), jnp.float32))
    mask = jnp.broadcast_to(causal[None, None], (B, 1, S, S))

    # --- self-attention with mask: fused-QKV fast path + masked kernel ------
    out, attn_mean = multi_head_attention(
        kparams, x, x, x, mask, num_heads=num_heads
    )
    jax.block_until_ready((out, attn_mean))

    assert out.shape == (B, S, d_model) and out.dtype == jnp.float32
    assert attn_mean.shape == (B, S, S)
    # rows of the (mean) attention matrix must sum to 1 (exact reciprocal now)
    assert jnp.allclose(jnp.sum(attn_mean, axis=-1), 1.0, atol=1e-3)

    # compare against a pure-JAX f32 reference (bf16 MXU -> loose tolerance)
    ref_out, ref_mean = reference_mha(params, x, x, x, mask, num_heads=num_heads)
    assert jnp.allclose(out, ref_out, atol=5e-2, rtol=5e-2)
    assert jnp.allclose(attn_mean, ref_mean, atol=5e-2, rtol=5e-2)

    # --- cross-attention, no mask: separate projections + mask-free kernel --
    y = jax.random.normal(ky_key, (B, S, d_model), jnp.float32)
    out2, mean2 = multi_head_attention(kparams, y, y, x, None, num_heads=num_heads)
    jax.block_until_ready((out2, mean2))
    ref_out2, ref_mean2 = reference_mha(params, y, y, x, None, num_heads=num_heads)
    assert jnp.allclose(out2, ref_out2, atol=5e-2, rtol=5e-2)
    assert jnp.allclose(mean2, ref_mean2, atol=5e-2, rtol=5e-2)

    print("KERNEL_OK")
</pallas_src>

<mosaic_0001>
module attributes {stable_mosaic.version = 11 : i64} {
  func.func @_linear_kernel(%arg0: i32, %arg1: i32, %arg2: i32, %arg3: memref<16x256xbf16, #tpu.memory_space<vmem>>, %arg4: memref<256x384xbf16, #tpu.memory_space<vmem>>, %arg5: memref<1x384xf32, #tpu.memory_space<vmem>>, %arg6: memref<16x384xbf16, #tpu.memory_space<vmem>>, %arg7: memref<16x384xf32, #tpu.memory_space<vmem>>) attributes {dimension_semantics = [#tpu.dimension_semantics<parallel>, #tpu.dimension_semantics<parallel>, #tpu.dimension_semantics<arbitrary>], iteration_bounds = array<i64: 1, 2, 1>, scalar_prefetch = 0 : i64, scratch_operands = 1 : i64, tpu.core_type = #tpu.core_type<tc>, window_params = [{transform_indices = @transform_0, window_bounds = array<i64: 16, 256>}, {transform_indices = @transform_1, window_bounds = array<i64: 256, 384>}, {transform_indices = @transform_2, window_bounds = array<i64: 1, 384>}, {transform_indices = @transform_3, window_bounds = array<i64: 16, 384>}]} {
    %c0_i32 = arith.constant 0 : i32
    %0 = arith.cmpi eq, %arg2, %c0_i32 : i32
    %1 = arith.extui %0 : i1 to i32
    %c0_i32_0 = arith.constant 0 : i32
    %2 = arith.cmpi ne, %1, %c0_i32_0 : i32
    scf.if %2 {
      %cst_10 = arith.constant 0.000000e+00 : f32
      %12 = vector.broadcast %cst_10 : f32 to vector<16x384xf32>
      %c0_11 = arith.constant 0 : index
      %c0_12 = arith.constant 0 : index
      %13 = vector.load %arg7[%c0_11, %c0_12] : memref<16x384xf32, #tpu.memory_space<vmem>>, vector<16x384xf32>
      tpu.vector_store %arg7[%c0_11, %c0_12], %12 {strides = array<i32>} : memref<16x384xf32, #tpu.memory_space<vmem>>, vector<16x384xf32>,
    } else {
    }
    %c0 = arith.constant 0 : index
    %c0_1 = arith.constant 0 : index
    %3 = vector.load %arg3[%c0, %c0_1] : memref<16x256xbf16, #tpu.memory_space<vmem>>, vector<16x256xbf16>
    %c0_2 = arith.constant 0 : index
    %c0_3 = arith.constant 0 : index
    %4 = vector.load %arg4[%c0_2, %c0_3] : memref<256x384xbf16, #tpu.memory_space<vmem>>, vector<256x384xbf16>
    %c0_4 = arith.constant 0 : index
    %c0_5 = arith.constant 0 : index
    %5 = vector.load %arg7[%c0_4, %c0_5] : memref<16x384xf32, #tpu.memory_space<vmem>>, vector<16x384xf32>
    %cst = arith.constant dense<0.000000e+00> : vector<16x384xf32>
    %6 = tpu.matmul %3, %4, %cst {dimension_numbers = #tpu.dot_dimension_numbers<[1], [0], [0], [1], [0, 0, 1, 1], [], []>} : vector<16x256xbf16>, vector<256x384xbf16>, vector<16x384xf32> -> vector<16x384xf32>
    %7 = arith.addf %5, %6 : vector<16x384xf32>
    %c0_6 = arith.constant 0 : index
    %c0_7 = arith.constant 0 : index
    %8 = vector.load %arg7[%c0_6, %c0_7] : memref<16x384xf32, #tpu.memory_space<vmem>>, vector<16x384xf32>
    tpu.vector_store %arg7[%c0_6, %c0_7], %7 {strides = array<i32>} : memref<16x384xf32, #tpu.memory_space<vmem>>, vector<16x384xf32>,
    %c0_i32_8 = arith.constant 0 : i32
    %9 = arith.cmpi eq, %arg2, %c0_i32_8 : i32
    %10 = arith.extui %9 : i1 to i32
    %c0_i32_9 = arith.constant 0 : i32
    %11 = arith.cmpi ne, %10, %c0_i32_9 : i32
    scf.if %11 {
      %c0_10 = arith.constant 0 : index
      %c0_11 = arith.constant 0 : index
      %12 = vector.load %arg7[%c0_10, %c0_11] : memref<16x384xf32, #tpu.memory_space<vmem>>, vector<16x384xf32>
      %c0_12 = arith.constant 0 : index
      %c0_13 = arith.constant 0 : index
      %13 = vector.load %arg5[%c0_12, %c0_13] : memref<1x384xf32, #tpu.memory_space<vmem>>, vector<1x384xf32>
      %14 = vector.broadcast %13 : vector<1x384xf32> to vector<16x384xf32>
      %15 = arith.addf %12, %14 : vector<16x384xf32>
      %16 = arith.truncf %15 : vector<16x384xf32> to vector<16x384xbf16>
      %c0_14 = arith.constant 0 : index
      %c0_15 = arith.constant 0 : index
      %17 = vector.load %arg6[%c0_14, %c0_15] : memref<16x384xbf16, #tpu.memory_space<vmem>>, vector<16x384xbf16>
      tpu.vector_store %arg6[%c0_14, %c0_15], %16 {strides = array<i32>} : memref<16x384xbf16, #tpu.memory_space<vmem>>, vector<16x384xbf16>,
    } else {
    }
    return
  }
  func.func @transform_0(%arg0: i32, %arg1: i32, %arg2: i32) -> (i32, i32) {
    %c0_i32 = arith.constant 0 : i32
    return %arg0, %arg2 : i32, i32
  }
  func.func @transform_1(%arg0: i32, %arg1: i32, %arg2: i32) -> (i32, i32) {
    %c0_i32 = arith.constant 0 : i32
    return %arg2, %arg1 : i32, i32
  }
  func.func @transform_2(%arg0: i32, %arg1: i32, %arg2: i32) -> (i32, i32) {
    %c0_i32 = arith.constant 0 : i32
    %c0_i32_0 = arith.constant 0 : i32
    return %c0_i32, %arg1 : i32, i32
  }
  func.func @transform_3(%arg0: i32, %arg1: i32, %arg2: i32) -> (i32, i32) {
    %c0_i32 = arith.constant 0 : i32
    return %arg0, %arg1 : i32, i32
  }
}

</mosaic_0001>

<bundles_post_ra>
// kernel: tpu_custom_call.1
= control target key start
LH: loop header
LB: loop body
LE: loop exit
PB: predicated region body
PF: predicated region fallthrough
CT: control target
= control target key end

     0   :  { %8 = vsyncpa [#allocation4], 0  ;;  %s1606_s0 = inlined_call_operand.hbm [shape: bf16[16,256], index: 0, kind: input, shape index: {}]   ;;  %s1607_s1 = inlined_call_operand.hbm [shape: bf16[256,768], index: 1, kind: input, shape index: {}]   ;;  %s1608_s2 = inlined_call_operand.vmem [shape: f32[1,768], index: 2, kind: input, shape index: {}]   ;;  %s1609_s3 = inlined_call_operand.hbm [shape: bf16[16,768], index: 3, kind: output, shape index: {}]  }
   0x1   :  { %9 = vsyncpa [#allocation7], 0 }
   0x2   :  { %11 = vsyncpa [#allocation7 + $0x1], 0 }
   0x3   :  { %12 = vsyncpa [#allocation5], 0 }
   0x4   :  { %14 = vsyncpa [#allocation5 + $0x1], 0  ;;  %s1323_s12 = smov 0   ;;  %s1325_s13 = smov 0  }
   0x5   :  { %s1327_s14 = smov 0   ;;  %s1329_s15 = smov 0  }
   0x6   :  { %s1331_s16 = smov 0   ;;  %s1333_s17 = smov 0  }
   0x7 LB: > { %s902_s18 = sadd.s32 4294967295, %s1290_s17   ;;  %s903_s19 = sadd.s32 4294967294, %s1290_s17   ;;  %s1290_s17 = sphi %s1333_s17, %s20_s17   ;;  %s1286_s16 = sphi %s1331_s16, %s1638_s16   ;;  %s1282_s15 = sphi %s1329_s15, %s1637_s15   ;;  %s1278_s14 = sphi %s1327_s14, %s1636_s14   ;;  %s1274_s13 = sphi %s1325_s13, %s1635_s13   ;;  %s1270_s12 = sphi %s1323_s12, %s1634_s12  }
   0x8   : > { %p83_p0 = scmp.ne.s32.totalorder %s1278_s14, %s1274_s13  ;;  %p84_p1 = scmp.eq.s32.totalorder %s1290_s17, 0 }
   0x9   : > { %p89_p2 = scmp.ne.s32.totalorder %s1274_s13, %s1270_s12  ;;  %p1361_p3 = scmp.eq.s32.totalorder %s902_s18, 0 }
   0xa   : > { %p141_p4 = scmp.eq.s32.totalorder %s902_s18, 1  ;;  %p1365_p5 = por %p84_p1, %p83_p0 }
   0xb   : > { %s1616_s21 = scalar_select %p1361_p3, 1, 0 }
   0xc   : > { %p147_p6 = scmp.eq.s32.totalorder %s903_s19, 1  ;;  %p1371_p7 = por %p1361_p3, %p89_p2 }
   0xd   : > { %p1375_p8 = por %p141_p4, %p83_p0  ;;  %p904_p10 = scmp.ge.s32.totalorder %s1290_s17, 1 }
   0xe   : > { %s1618_s23 = scalar_select %p1371_p7, 1, 0 }
   0xf   : > { %s1619_s24 = scalar_select %p1375_p8, 1, 0 }
  0x10   : > { %p1379_p9 = por %p147_p6, %p89_p2  ;;  %p154_p11 = scmp.lt.s32.totalorder %s1290_s17, 3 }
  0x11   : > { %s1292_s27 = smov [#allocation3]   ;;  %p1019_p1 = scmp.lt.s32.totalorder %s1290_s17, 2 }
  0x12   : > { %s1620_s25 = scalar_select %p1379_p9, 1, 0 }
  0x13   : > { %p1385_p12 = pnand %p904_p10, %p154_p11  ;;  %s172_s28 = sshll.u32 %s1292_s27, 4  ;;  %s1389_s28 = int_to_ptr.vmem [resolvable:$true] %s172_s28 }
  0x14   : > { %p1403_p4 = pnand %p1019_p1, %p1365_p5  ;;  %s35_s4 = sadd.s32 1, %s1286_s16 }
  0x15   : > { %s1621_s26 = scalar_select %p1385_p12, 1, 0 }
  0x16   : > { %p1006_p13 = pneg %p1385_p12  ;;  %p1408_p6 = scmp.ge.s32.totalorder %s35_s4, 2 }
  0x17   : > { %s1623_s30 = scalar_select %p1403_p4, 1, 0 }
  0x18   : > { %p1397_p2 = pnand %p1006_p13, %p1361_p3  ;;  %s1146_s8 = scalar_lea.hbm %s1606_s0, 256 }
  0x19   : > { %s1624_s5 = scalar_select %p1408_p6, 1, 0 }
  0x1a   : > { %p1147_p10 = scmp.ne.s32.totalorder %s1606_s0, %s1146_s8  ;;  %p1148_p11 = pneg %p1397_p2 }
  0x1b   : > { %p1153_p1 = scmp.lt.u32.totalorder %s1146_s8, %s1606_s0 }
  0x1c   : > { %p1149_p13 = pnand %p1148_p11, %p1147_p10 }
  0x1e   : > { %p1150_p5 = pneg %p1149_p13 }
  0x20   : > { %p1155_p0 = pnand %p1153_p1, %p1150_p5 }
  0x22   : > { %1158 = shalt.err (!%p1155_p0)
}
  0x23   : > { %s1159_s19 = scalar_lea.vmem %s1389_s28, 256  ;;  %p1167_p3 = scmp.lt.s32.totalorder %s1389_s28, %s1389_s28 }
  0x24   : > { %p1160_p9 = scmp.ne.s32.totalorder %s1389_s28, %s1159_s19  ;;  %p1168_p12 = scmp.lt.s32.totalorder %s1159_s19, %s1159_s19 }
  0x26   : > { %p1162_p8 = pnand %p1160_p9, %p1148_p11  ;;  %p1169_p4 = por %p1168_p12, %p1167_p3 }
  0x28   : > { %p1163_p7 = pneg %p1162_p8 }
  0x2a   : > { %p1170_p6 = pnand %p1169_p4, %p1163_p7 }
  0x2c   : > { %1173 = shalt.err (!%p1170_p6)
}
  0x2d   : > { %s1293_s22 = smov 128   ;;  %s1294_s27 = smov 8  }
  0x2e   : > { %1009 = dma.hbm_to_vmem [thread:$0]  (!%p1397_p2), %s1606_s0, 256, %s1389_s28, [#allocation4], %s1293_s22, %s1293_s22, %s1294_s27  }
  0x2f   : > { %s186_s8 = sand.u32 1, %s1278_s14   ;;  %p1625_p3 = scmp.ne.s32.totalorder %s1624_s5, 0 }
  0x30   : > { %s995_s9 = smul.u32 384, %s186_s8  ;;  %s1626_s22 = sadd.s32 1, %s1278_s14 }
  0x31   : > { %s1640_s4 = smov (%p1625_p3, %s35_s4), 0  ;;  %s967_s11 = smul.u32 192, %s1286_s16 }
  0x32   : > { %s72_s10 = ssub.s32 %s1286_s16, %s1640_s4  ;;  %s190_s28 = scalar_lea.vmem [#allocation6], %s995_s9 }
  0x33   : > { %p74_p7 = scmp.eq.s32.totalorder %s72_s10, 0  ;;  %s1444_s20 = scalar_lea.hbm %s1607_s1, %s967_s11 }
  0x34   : > { %s200_s29 = sshll.u32 %s190_s28, 4  ;;  %s1453_s27 = scalar_lea.sflag [#allocation7], %s186_s8  ;;  %s1451_s29 = int_to_ptr.vmem [resolvable:$true] %s200_s29 }
  0x35   : > { %s1449_s5 = scalar_select %p74_p7, %s1278_s14, %s1626_s22  }
  0x36   : > { %s1174_s6 = scalar_lea.hbm %s1444_s20, 6144  ;;  %p1627_p9 = scmp.ne.s32.totalorder %s1623_s30, 0 }
  0x37   : > { %p1175_p8 = scmp.ne.s32.totalorder %s1444_s20, %s1174_s6  ;;  %s1179_s9 = scalar_lea.hbm %s1607_s1, 12288 }
  0x38   : > { %p1176_p12 = pneg %p1627_p9  ;;  %p1180_p4 = scmp.lt.u32.totalorder %s1444_s20, %s1607_s1 }
  0x39   : > { %p1181_p6 = scmp.lt.u32.totalorder %s1179_s9, %s1174_s6  ;;  %p1183_p11 = scmp.lt.u32.totalorder %s1174_s6, %s1444_s20 }
  0x3a   : > { %p1177_p0 = pnand %p1176_p12, %p1175_p8 }
  0x3b   : > { %p1182_p10 = por %p1181_p6, %p1180_p4 }
  0x3c   : > { %p1178_p2 = pneg %p1177_p0 }
  0x3d   : > { %p1184_p13 = por %p1183_p11, %p1182_p10 }
  0x3f   : > { %p1185_p5 = pnand %p1184_p13, %p1178_p2 }
  0x41   : > { %1188 = shalt.err (!%p1185_p5)
}
  0x42   : > { %s1189_s8 = scalar_lea.vmem %s1451_s29, 6144  ;;  %s1295_s19 = smov [#allocation6]  }
  0x43   : > { %p1190_p1 = scmp.ne.s32.totalorder %s1451_s29, %s1189_s8  ;;  %s1194_s28 = sshll.u32 %s1295_s19, 4  ;;  %s1195_s28 = int_to_ptr.vmem [resolvable:$false] %s1194_s28 }
  0x44   : > { %s1196_s22 = scalar_lea.vmem %s1195_s28, 12288  ;;  %p1197_p8 = scmp.lt.s32.totalorder %s1451_s29, %s1195_s28 }
  0x45   : > { %p1192_p3 = pnand %p1190_p1, %p1176_p12  ;;  %p1198_p0 = scmp.lt.s32.totalorder %s1196_s22, %s1189_s8 }
  0x47   : > { %p1193_p7 = pneg %p1192_p3  ;;  %p1199_p4 = por %p1198_p0, %p1197_p8 }
  0x49   : > { %p1200_p6 = pnand %p1199_p4, %p1193_p7 }
  0x4b   : > { %1203 = shalt.err (!%p1200_p6)
}
  0x4c   : > { %s1296_s6 = smov 384   ;;  %s1297_s7 = smov 192  }
  0x4d   : > { %s1298_s10 = smov 12   ;;  %p1628_p12 = scmp.ne.s32.totalorder %s1621_s26, 0 }
  0x4e   : > { %1013 = dma.hbm_to_vmem [thread:$0]  (!%p1627_p9), %s1444_s20, 6144, %s1451_s29, %s1453_s27, %s1296_s6, %s1297_s7, %s1298_s10  }
  0x4f   : > { %220 = sbr.rel (%p1628_p12) target bundleno = 392 (0x188), region = 32  ;;  %p1629_p2 = scmp.ne.s32.totalorder (!%p1628_p12), %s1616_s21, 0 }
  0x56   : > { %1257 = dma.done.wait (%p1629_p2), [#allocation4], 256  }
  0x57   : > { %1259 = vsyncadd (%p1629_p2), [#allocation4], 4294967040  ;;  %s1488_s9 = sand.u32 1, %s1274_s13   ;;  %p1630_p9 = scmp.ne.s32.totalorder %s1618_s23, 0 }
  0x58   : > { %s996_s11 = smul.u32 384, %s1488_s9  ;;  %s227_s18 = scalar_lea.sflag [#allocation7], %s1488_s9 }
  0x5a   : > { %s1492_s8 = scalar_lea.vmem [#allocation6], %s996_s11 }
  0x5b   : > { %1261 = dma.done.wait (%p1630_p9), %s227_s18, 6144  }
  0x5c   : > { %1263 = vsyncadd (%p1630_p9), %s227_s18, 4294961152  ;;  %v1079_v0 = vld [vmem:[%s1492_s8 + $0x4] ss:$12 sps:$4 sm:$0xff]   ;;  %v1081_v1 = vld [vmem:[%s1492_s8] ss:$12 sps:$4 sm:$0xff]   ;;  %s261_s20 = smul.u32 3, %s1282_s15  ;;  %v724_v50 = vlaneseq }
  0x5d   : > { %617 = vmatprep.subr.bf16.mxu0 %v1079_v0  ;;  %v1082_v2 = vld [vmem:[%s1492_s8 + $0x1c] ss:$12 sps:$4 sm:$0xff]   ;;  %v1084_v3 = vld [vmem:[%s1492_s8 + $0x18] ss:$12 sps:$4 sm:$0xff]   ;;  %v1085_v4 = vld [vmem:[%s1492_s8 + $0x34] ss:$12 sps:$4 sm:$0xff]  }
  0x5e   : > { %618 = vmatpush1.bf16.msra.mxu0 %v1081_v1  ;;  %v1087_v5 = vld [vmem:[%s1492_s8 + $0x30] ss:$12 sps:$4 sm:$0xff]   ;;  %v1088_v6 = vld [vmem:[%s1492_s8 + $0x4c] ss:$12 sps:$4 sm:$0xff]   ;;  %v1100_v7 = vld [vmem:[%s1492_s8 + $0xc8] ss:$12 sps:$4 sm:$0xff]  }
  0x5f   : > { %619 = vmatprep.subr.bf16.mxu0 %v1082_v2  ;;  %v1090_v8 = vld [vmem:[%s1492_s8 + $0x48] ss:$12 sps:$4 sm:$0xff]   ;;  %v1091_v9 = vld [vmem:[%s1492_s8 + $0x64] ss:$12 sps:$4 sm:$0xff]   ;;  %973 = vmatprep.subr.bf16.mxu1 %v1100_v7  ;;  %v1105_v11 = vld [vmem:[%s1492_s8 + $0xe0] ss:$12 sps:$4 sm:$0xff]  }
  0x60   : > { %v1103_v10 = vld [vmem:[%s1492_s8 + $0x8] ss:$12 sps:$4 sm:$0xff]   ;;  %v1093_v12 = vld [vmem:[%s1492_s8 + $0x60] ss:$12 sps:$4 sm:$0xff]   ;;  %v1110_v15 = vld [vmem:[%s1492_s8 + $0xf8] ss:$12 sps:$4 sm:$0xff]  }
  0x61   : > { %974 = vmatpush3.bf16.msra.mxu1 %v1103_v10  ;;  %v1094_v13 = vld [vmem:[%s1492_s8 + $0x7c] ss:$12 sps:$4 sm:$0xff]   ;;  %v1108_v14 = vld [vmem:[%s1492_s8 + $0x20] ss:$12 sps:$4 sm:$0xff]   ;;  %v1096_v16 = vld [vmem:[%s1492_s8 + $0x78] ss:$12 sps:$4 sm:$0xff]  }
  0x62   : > { %620 = vmatpush1.bf16.msra.mxu0 %v1084_v3  ;;  %975 = vmatprep.subr.bf16.mxu1 %v1105_v11  ;;  %v1113_v17 = vld [vmem:[%s1492_s8 + $0x38] ss:$12 sps:$4 sm:$0xff]   ;;  %v1097_v18 = vld [vmem:[%s1492_s8 + $0x94] ss:$12 sps:$4 sm:$0xff]   ;;  %v1115_v19 = vld [vmem:[%s1492_s8 + $0x110] ss:$12 sps:$4 sm:$0xff]  }
  0x63   : > { %621 = vmatprep.subr.bf16.mxu0 %v1085_v4  ;;  %v1099_v20 = vld [vmem:[%s1492_s8 + $0x90] ss:$12 sps:$4 sm:$0xff]   ;;  %v1120_v22 = vld [vmem:[%s1492_s8 + $0x128] ss:$12 sps:$4 sm:$0xff]   ;;  %v1101_v23 = vld [vmem:[%s1492_s8 + $0xac] ss:$12 sps:$4 sm:$0xff]  }
  0x64   : > { %v1118_v21 = vld [vmem:[%s1492_s8 + $0x50] ss:$12 sps:$4 sm:$0xff]   ;;  %v1104_v24 = vld [vmem:[%s1492_s8 + $0xa8] ss:$12 sps:$4 sm:$0xff]   ;;  %v1125_v26 = vld [vmem:[%s1492_s8 + $0x140] ss:$12 sps:$4 sm:$0xff]  }
  0x65   : > { %976 = vmatpush3.bf16.msra.mxu1 %v1108_v14  ;;  %v1123_v25 = vld [vmem:[%s1492_s8 + $0x68] ss:$12 sps:$4 sm:$0xff]   ;;  %v1106_v27 = vld [vmem:[%s1492_s8 + $0xc4] ss:$12 sps:$4 sm:$0xff]   ;;  %v1109_v28 = vld [vmem:[%s1492_s8 + $0xc0] ss:$12 sps:$4 sm:$0xff]  }
  0x66   : > { %622 = vmatpush1.bf16.msra.mxu0 %v1087_v5  ;;  %977 = vmatprep.subr.bf16.mxu1 %v1110_v15  ;;  %v1128_v29 = vld [vmem:[%s1492_s8 + $0x80] ss:$12 sps:$4 sm:$0xff]   ;;  %v1130_v30 = vld [vmem:[%s1492_s8 + $0x158] ss:$12 sps:$4 sm:$0xff]   ;;  %v1111_v31 = vld [vmem:[%s1492_s8 + $0xdc] ss:$12 sps:$4 sm:$0xff]  }
  0x67   : > { %623 = vmatprep.subr.bf16.mxu0 %v1088_v6  ;;  %v1133_v32 = vld [vmem:[%s1492_s8 + $0x98] ss:$12 sps:$4 sm:$0xff]   ;;  %v1135_v34 = vld [vmem:[%s1492_s8 + $0x170] ss:$12 sps:$4 sm:$0xff]   ;;  %v1116_v35 = vld [vmem:[%s1492_s8 + $0xf4] ss:$12 sps:$4 sm:$0xff]  }
  0x68   : > { %v1114_v33 = vld [vmem:[%s1492_s8 + $0xd8] ss:$12 sps:$4 sm:$0xff]   ;;  %v1142_v36 = vld [vmem:[#allocation3 + $0x4] ss:$8 sps:$4 sm:$0xff]   ;;  %v1129_v43 = vld [vmem:[%s1492_s8 + $0x120] ss:$12 sps:$4 sm:$0xff]  }
  0x69   : > { %978 = vmatpush3.bf16.msra.mxu1 %v1113_v17  ;;  %v1138_v37 = vld [vmem:[%s1492_s8 + $0xb0] ss:$12 sps:$4 sm:$0xff]   ;;  %v1121_v39 = vld [vmem:[%s1492_s8 + $0x10c] ss:$12 sps:$4 sm:$0xff]   ;;  %692 = vmatprep.mubr.bf16.mxu1 %v1142_v36  ;;  %v1124_v41 = vld [vmem:[%s1492_s8 + $0x108] ss:$12 sps:$4 sm:$0xff]  }
  0x6a   : > { %624 = vmatpush1.bf16.msra.mxu0 %v1090_v8  ;;  %979 = vmatprep.subr.bf16.mxu1 %v1115_v19  ;;  %v1119_v38 = vld [vmem:[%s1492_s8 + $0xf0] ss:$12 sps:$4 sm:$0xff]   ;;  %v1134_v45 = vld [vmem:[%s1492_s8 + $0x138] ss:$12 sps:$4 sm:$0xff]   ;;  %v1136_v46 = vld [vmem:[%s1492_s8 + $0x154] ss:$12 sps:$4 sm:$0xff]  }
  0x6b   : > { %625 = vmatprep.subr.bf16.mxu0 %v1091_v9  ;;  %v1140_v40 = vld [vmem:[#allocation3] ss:$8 sps:$4 sm:$0xff]   ;;  %649 = vmatprep.mubr.bf16.mxu0 %v1142_v36  ;;  %v1131_v44 = vld [vmem:[%s1492_s8 + $0x13c] ss:$12 sps:$4 sm:$0xff]   ;;  %p262_p10 = scmp.lt.s32.totalorder %s261_s20, 5  ;;  %v725_v51 = vshrl.u32 %v724_v50, 7 }
  0x6c   : > { %v1126_v42 = vld [vmem:[%s1492_s8 + $0x124] ss:$12 sps:$4 sm:$0xff]   ;;  %v1143_v48 = vld [vmem:[%s1492_s8 + $0x16c] ss:$12 sps:$4 sm:$0xff]   ;;  %v1145_v49 = vld [vmem:[%s1492_s8 + $0x168] ss:$12 sps:$4 sm:$0xff]  }
  0x6d   : > { %980 = vmatpush3.bf16.msra.mxu1 %v1118_v21  ;;  %v1139_v47 = vld [vmem:[%s1492_s8 + $0x150] ss:$12 sps:$4 sm:$0xff]   ;;  %s1642_s20 = smov (!%p262_p10, %s261_s20), 5  ;;  %v734_v52 = vsub.s32 2, %v725_v51  ;;  %s997_s30 = smul.u32 24, %s1488_s9  ;;  %v726_v1 = vsub.s32 0, %v725_v51 }
  0x6e   : > { %626 = vmatpush1.bf16.msra.mxu0 %v1093_v12  ;;  %981 = vmatprep.subr.bf16.mxu1 %v1120_v22  ;;  %s264_s26 = scalar_lea.vmem %s1608_s2, %s1642_s20  ;;  %v730_v2 = vsub.s32 1, %v725_v51  ;;  %s972_s19 = smul.u32 192, %s1282_s15 }
  0x6f   : > { %627 = vmatprep.subr.bf16.mxu0 %v1094_v13  ;;  %v722_v53 = vld [vmem:[%s264_s26] sm:$0x7]  ;;  %s256_s29 = scalar_lea.vmem [#allocation8], %s997_s30  ;;  %s770_s15 = scalar_lea.sflag [#allocation5], %s1488_s9 }
  0x70   : > { %v735_v55 = vrot.slane %v722_v53, %v734_v52  ;;  %v727_v3 = vrot.slane %v722_v53, %v726_v1  ;;  %v731_v4 = vrot.slane %v722_v53, %v730_v2  ;;  %s786_s27 = sshll.u32 %s256_s29, 4  ;;  %s1557_s6 = scalar_lea.hbm %s1609_s3, %s972_s19  ;;  %s1552_s27 = int_to_ptr.vmem [resolvable:$true] %s786_s27 }
  0x71   : > { %982 = vmatpush3.bf16.msra.mxu1 %v1123_v25  ;;  %s1204_s7 = scalar_lea.vmem %s1552_s27, 384  ;;  %p1631_p13 = scmp.ne.s32.totalorder %s1619_s24, 0 }
  0x72   : > { %628 = vmatpush1.bf16.msra.mxu0 %v1096_v16  ;;  %983 = vmatprep.subr.bf16.mxu1 %v1125_v26  ;;  %p1205_p11 = scmp.ne.s32.totalorder %s1552_s27, %s1204_s7  ;;  %s1299_s10 = smov [#allocation8]  }
  0x73   : > { %629 = vmatprep.subr.bf16.mxu0 %v1097_v18  ;;  %s1208_s11 = sshll.u32 %s1299_s10, 4  ;;  %s1209_s11 = int_to_ptr.vmem [resolvable:$false] %s1208_s11 }
  0x74   : > { %p1206_p5 = pnand %p1205_p11, %p1631_p13  ;;  %s1210_s18 = scalar_lea.vmem %s1209_s11, 768 }
  0x75   : > { %984 = vmatpush3.bf16.msra.mxu1 %v1128_v29  ;;  %p1211_p3 = scmp.lt.s32.totalorder %s1552_s27, %s1209_s11  ;;  %p1212_p7 = scmp.lt.s32.totalorder %s1210_s18, %s1204_s7 }
  0x76   : > { %630 = vmatpush1.bf16.msra.mxu0 %v1099_v20  ;;  %985 = vmatprep.subr.bf16.mxu1 %v1130_v30  ;;  %p1207_p1 = pneg %p1206_p5 }
  0x77   : > { %631 = vmatprep.subr.bf16.mxu0 %v1101_v23  ;;  %p1213_p8 = por %p1212_p7, %p1211_p3 }
  0x79   : > { %986 = vmatpush3.bf16.msra.mxu1 %v1133_v32  ;;  %p1214_p0 = pnand %p1213_p8, %p1207_p1 }
  0x7a   : > { %632 = vmatpush1.bf16.msra.mxu0 %v1104_v24  ;;  %987 = vmatprep.subr.bf16.mxu1 %v1135_v34 }
  0x7b   : > { %633 = vmatprep.subr.bf16.mxu0 %v1106_v27 }
  0x7d   : > { %988 = vmatpush3.bf16.msra.mxu1 %v1138_v37 }
  0x7e   : > { %634 = vmatpush1.bf16.msra.mxu0 %v1109_v28 }
  0x7f   : > { %635 = vmatprep.subr.bf16.mxu0 %v1111_v31 }
  0x80   : > { %693 = vmatmul.mubr.bf16.vlgmr.msra.gmra.mrb[0].mxu1 %v1140_v40 }
  0x82   : > { %636 = vmatpush1.bf16.msra.mxu0 %v1114_v33 }
  0x83   : > { %637 = vmatprep.subr.bf16.mxu0 %v1116_v35 }
  0x86   : > { %638 = vmatpush1.bf16.msra.mxu0 %v1119_v38 }
  0x87   : > { %639 = vmatprep.subr.bf16.mxu0 %v1121_v39 }
  0x8a   : > { %640 = vmatpush1.bf16.msra.mxu0 %v1124_v41 }
  0x8b   : > { %641 = vmatprep.subr.bf16.mxu0 %v1126_v42 }
  0x8e   : > { %642 = vmatpush1.bf16.msra.mxu0 %v1129_v43 }
  0x8f   : > { %643 = vmatprep.subr.bf16.mxu0 %v1131_v44 }
  0x92   : > { %644 = vmatpush1.bf16.msra.mxu0 %v1134_v45 }
  0x93   : > { %645 = vmatprep.subr.bf16.mxu0 %v1136_v46 }
  0x96   : > { %646 = vmatpush1.bf16.msra.mxu0 %v1139_v47 }
  0x97   : > { %647 = vmatprep.subr.bf16.mxu0 %v1143_v48 }
  0x9a   : > { %648 = vmatpush1.bf16.msra.mxu0 %v1145_v49 }
  0x9d   : > { %650 = vmatmul.mubr.bf16.vlgmr.msra.gmra.mrb[0].mxu0 %v1140_v40 }
 0x153   : > { %v989_v54 = vpop.f32.mrb[0].mxu1 }
 0x154   : > { %v990_v56 = vpop.f32.mrb[1].mxu1 }
 0x155   : > { %v991_v57 = vadd.f32 %v990_v56, %v989_v54  ;;  %v992_v58 = vpop.f32.mrb[2].mxu1 }
 0x156   : > { %v993_v59 = vpop.f32.mrb[3].mxu1 }
 0x157   : > { %v741_v60 = vadd.f32 %v991_v57, %v735_v55  ;;  %v994_v61 = vadd.f32 %v993_v59, %v992_v58 }
 0x159   : > { %v969_v62 = vpack.c.bf16 %v741_v60, %v741_v60  ;;  %v744_v63 = vadd.f32 %v994_v61, %v735_v55 }
 0x15b   : > { %766 = vst [vmem:[%s256_s29 + $0x8] sm:$0xf] %v969_v62  ;;  %v971_v0 = vpack.c.bf16 %v744_v63, %v744_v63 }
 0x15d   : > { %768 = vst [vmem:[%s256_s29 + $0x14] sm:$0xf] %v971_v0 }
 0x170   : > { %v651_v5 = vpop.f32.mrb[0].mxu0 }
 0x171   : > { %v739_v6 = vadd.f32 %v727_v3, %v651_v5  ;;  %v653_v7 = vpop.f32.mrb[1].mxu0 }
 0x172   : > { %v740_v8 = vadd.f32 %v731_v4, %v653_v7  ;;  %v655_v9 = vpop.f32.mrb[2].mxu0 }
 0x173   : > { %v742_v10 = vadd.f32 %v727_v3, %v655_v9  ;;  %v657_v11 = vpop.f32.mrb[3].mxu0 }
 0x174   : > { %v968_v12 = vpack.c.bf16 %v740_v8, %v739_v6  ;;  %v743_v13 = vadd.f32 %v731_v4, %v657_v11 }
 0x176   : > { %765 = vst [vmem:[%s256_s29] sm:$0xff] %v968_v12  ;;  %v970_v14 = vpack.c.bf16 %v743_v13, %v742_v10 }
 0x178   : > { %767 = vst [vmem:[%s256_s29 + $0xc] sm:$0xff] %v970_v14 }
 0x179   : > { %1217 = shalt.err (!%p1214_p0)
}
 0x17a   : > { %s1218_s8 = scalar_lea.hbm %s1557_s6, 384  ;;  %s1222_s23 = scalar_lea.hbm %s1609_s3, 768 }
 0x17b   : > { %p1219_p4 = scmp.ne.s32.totalorder %s1557_s6, %s1218_s8  ;;  %p1223_p2 = scmp.lt.u32.totalorder %s1557_s6, %s1609_s3 }
 0x17c   : > { %p1224_p9 = scmp.lt.u32.totalorder %s1222_s23, %s1218_s8  ;;  %p1226_p11 = scmp.lt.u32.totalorder %s1218_s8, %s1557_s6 }
 0x17d   : > { %p1220_p6 = pnand %p1219_p4, %p1631_p13 }
 0x17e   : > { %p1225_p10 = por %p1224_p9, %p1223_p2 }
 0x17f   : > { %p1221_p12 = pneg %p1220_p6 }
 0x180   : > { %p1227_p5 = por %p1226_p11, %p1225_p10 }
 0x182   : > { %p1228_p1 = pnand %p1227_p5, %p1221_p12 }
 0x184   : > { %1231 = shalt.err (!%p1228_p1)
}
 0x185   : > { %s1300_s29 = smov 192   ;;  %s1301_s19 = smov 384  }
 0x186   : > { %s1302_s28 = smov 12  }
 0x187   : > { %1004 = dma.vmem_to_hbm [thread:$0]  (%p1631_p13), %s1552_s27, 384, %s1557_s6, %s770_s15, %s1300_s29, %s1301_s19, %s1302_s28  }
 0x188 PF: > { %s801_s22 = sand.u32 1, %s1270_s12   ;;  %p1632_p3 = scmp.ne.s32.totalorder %s1620_s25, 0 }
 0x189   : > { %p1633_p7 = scmp.ge.s32.totalorder %s1290_s17, 2  ;;  %s802_s7 = scalar_lea.sflag [#allocation5], %s801_s22 }
 0x18b   : > { %p1015_p8 = pnand %p1633_p7, %p1632_p3 }
 0x18d   : > { %1265 = dma.done.wait (!%p1015_p8), %s802_s7, 384  }
 0x18e   : > { %1267 = vsyncadd (!%p1015_p8), %s802_s7, 4294966912  ;;  %s20_s17 = sadd.s32 1, %s1290_s17   ;;  %s1634_s12 = smov %s1274_s13 }
 0x18f   : > { %p17_p0 = scmp.ge.s32.totalorder %s20_s17, 4   ;;  %s1635_s13 = smov %s1278_s14 }
 0x190   : > { %s1636_s14 = smov %s1449_s5  ;;  %s1637_s15 = smov %s1286_s16 }
 0x191   : > { %s1638_s16 = smov %s1640_s4  ;;  %19 = sbr.rel (!%p17_p0) target bundleno = 7 (0x7), region = 94 }
 0x198   :  { %807 = vsyncpa [#allocation4], 1 }
 0x199   :  { %809 = vsyncpa [#allocation4 + $0x1], 1 }
 0x19a   :  { %810 = vsyncpa [#allocation7], 1 }
 0x19b   :  { %812 = vsyncpa [#allocation7 + $0x1], 1 }
 0x19c   :  { %813 = vsyncpa [#allocation5], 1 }
 0x19d   :  { %815 = vsyncpa [#allocation5 + $0x1], 1 }

</bundles_post_ra>
